<compile_context>
chip_gen: v6e
topology: v6e:2x2x1
jax: 0.10.0
libtpu: 0.0.40
codegen_flags: <defaults>
</compile_context>

<pallas_src>
import jax
import jax.numpy as jnp
from jax.experimental import pallas as pl
from jax.experimental.pallas import tpu as pltpu

# ---- model dimensions & flat parameter layout -------------------------------
D_IN, H1, H2, D_OUT = 10, 5, 3, 1
W1_OFF = 0
B1_OFF = W1_OFF + H1 * D_IN          # 50
W2_OFF = B1_OFF + H1                 # 55
B2_OFF = W2_OFF + H2 * H1            # 70
W3_OFF = B2_OFF + H2                 # 73
B3_OFF = W3_OFF + D_OUT * H2         # 76
P_LEN = B3_OFF + D_OUT               # 77
P_PAD = 128                          # 1D SMEM pads to next_pow2(4N) = 512 B

LANE = 128                           # lanes per vreg
SUB = 8                              # sublanes per vreg (8 samples folded)
TBL_MAX = 8192                       # lanes per grid step (= 65536 samples)


def mlp_kernel(p_ref, x_ref, o_ref):
    """p_ref: f32[P_PAD] in SMEM (packed W1,b1,W2,b2,W3,b3)
       x_ref: f32[D_IN*8, TBL] in VMEM, feature-major folded batch
              (row = feature*8 + sublane, col = lane)
       o_ref: f32[8, TBL] in VMEM"""
    # Feature i lives in 8 contiguous sublanes -> one full (8, TBL) vreg tile.
    x_f = [x_ref[SUB * i:SUB * (i + 1), :] for i in range(D_IN)]

    # layer 1: Linear(10 -> 5) + ReLU — unrolled scalar-broadcast FMAs (VPU)
    h1 = []
    for o in range(H1):
        acc = x_f[0] * p_ref[W1_OFF + o * D_IN]
        for i in range(1, D_IN):
            acc = acc + x_f[i] * p_ref[W1_OFF + o * D_IN + i]
        h1.append(jnp.maximum(acc + p_ref[B1_OFF + o], 0.0))

    # layer 2: Linear(5 -> 3) + ReLU
    h2 = []
    for o in range(H2):
        acc = h1[0] * p_ref[W2_OFF + o * H1]
        for i in range(1, H1):
            acc = acc + h1[i] * p_ref[W2_OFF + o * H1 + i]
        h2.append(jnp.maximum(acc + p_ref[B2_OFF + o], 0.0))

    # output layer: Linear(3 -> 1) + Sigmoid
    z = h2[0] * p_ref[W3_OFF]
    z = z + h2[1] * p_ref[W3_OFF + 1]
    z = z + h2[2] * p_ref[W3_OFF + 2]
    z = z + p_ref[B3_OFF]
    # exact sigmoid with a single EUP op: sigmoid(z) = 0.5*tanh(z/2) + 0.5
    o_ref[...] = 0.5 * jnp.tanh(0.5 * z) + 0.5


def _tile_lanes(B):
    """Pick (lanes_per_block, total_lanes, padded_batch, n_blocks)."""
    l_min = -(-B // SUB)                                  # ceil(B / 8)
    l_min = ((l_min + LANE - 1) // LANE) * LANE           # lane-align
    if l_min <= LANE:
        tbl = LANE                                        # tiny batch: 1 block
    elif l_min <= 2 * TBL_MAX:
        # mid-size batch: split into 2 blocks so v7x's second TC gets work
        tbl = ((-(-l_min // 2)) + LANE - 1) // LANE * LANE
    else:
        tbl = TBL_MAX                                     # large batch: cap tile
    lp = ((l_min + tbl - 1) // tbl) * tbl
    return tbl, lp, SUB * lp, lp // tbl


def mymodel_forward(x, params):
    """x: f32[B, 10]; params: torch-convention (out, in) weights + (out,) biases.
       Returns f32[B, 1] = sigmoid(relu(relu(x@W1.T+b1)@W2.T+b2)@W3.T+b3)."""
    w1, b1, w2, b2, w3, b3 = params
    x = x.astype(jnp.float32)
    B = x.shape[0]

    TBL, Lp, Bp, n_blocks = _tile_lanes(B)

    # Fold 8 samples onto the sublane axis, feature-major rows:
    #   xF[f*8 + s, l] = x_pad[s*Lp + l, f]
    # This pad+fold is a single fused copy; for production callers should
    # supply xF directly so no HBM re-layout happens outside the kernel.
    # TODO(synk): expose the folded (D_IN*8, Lp) layout as the public contract.
    x_pad = jnp.zeros((Bp, D_IN), jnp.float32).at[:B, :].set(x)
    xF = x_pad.reshape(SUB, Lp, D_IN).transpose(2, 0, 1).reshape(D_IN * SUB, Lp)

    # single packed parameter slab -> one tiny SMEM buffer, one DMA
    flat = jnp.concatenate([w1.reshape(-1), b1.reshape(-1),
                            w2.reshape(-1), b2.reshape(-1),
                            w3.reshape(-1), b3.reshape(-1)]).astype(jnp.float32)
    p_packed = jnp.zeros((P_PAD,), jnp.float32).at[:P_LEN].set(flat)

    cost = pl.CostEstimate(
        flops=2 * Bp * (D_IN * H1 + H1 * H2 + H2 * D_OUT),
        transcendentals=Bp,                               # one tanh per sample
        bytes_accessed=Bp * D_IN * 4 + Bp * 4 + P_PAD * 4,
    )

    outF = pl.pallas_call(
        mlp_kernel,
        out_shape=jax.ShapeDtypeStruct((SUB, Lp), jnp.float32),
        grid=(n_blocks,),
        in_specs=[
            pl.BlockSpec(memory_space=pltpu.MemorySpace.SMEM),    # packed params
            pl.BlockSpec((D_IN * SUB, TBL), lambda i: (0, i)),    # folded x tile
        ],
        out_specs=pl.BlockSpec((SUB, TBL), lambda i: (0, i)),
        compiler_params=pltpu.CompilerParams(
            dimension_semantics=("parallel",)),                   # v7x: 2 TCs
        cost_estimate=cost,
    )(p_packed, xF)

    # Padded samples hold garbage (they ran through the net with zero inputs);
    # they are sliced off here.  Back to the public (B, 1) layout:
    # out[n] = outF[n // Lp, n % Lp]
    return outF.reshape(Bp)[:B].reshape(B, 1)


def init_params(key):
    """Deterministic init mimicking nn.Linear default (uniform +/- 1/sqrt(fan_in)),
    torch weight convention: W is (out_features, in_features), b is (out_features,)."""
    def linear(k, fan_in, fan_out):
        k_w, k_b = jax.random.split(k)
        bound = 1.0 / jnp.sqrt(fan_in)
        w = jax.random.uniform(k_w, (fan_out, fan_in), jnp.float32, -bound, bound)
        b = jax.random.uniform(k_b, (fan_out,), jnp.float32, -bound, bound)
        return w, b

    k1, k2, k3 = jax.random.split(key, 3)
    w1, b1 = linear(k1, D_IN, H1)
    w2, b2 = linear(k2, H1, H2)
    w3, b3 = linear(k3, H2, D_OUT)
    return w1, b1, w2, b2, w3, b3


if __name__ == "__main__":
    key = jax.random.PRNGKey(0)
    k_param, k_x = jax.random.split(key)
    params = init_params(k_param)

    B = 8
    x = jax.random.normal(k_x, (B, D_IN), jnp.float32)

    out = mymodel_forward(x, params)
    out = jax.block_until_ready(out)

    # pure-JAX reference check (tanh-based sigmoid is exact, tight tolerance)
    w1, b1, w2, b2, w3, b3 = params
    h1 = jnp.maximum(x @ w1.T + b1, 0.0)
    h2 = jnp.maximum(h1 @ w2.T + b2, 0.0)
    ref = jax.nn.sigmoid(h2 @ w3.T + b3)
    assert out.shape == (B, 1)
    assert jnp.allclose(out, ref, atol=1e-5), "mismatch vs reference"

    print("KERNEL_OK")
</pallas_src>

<mosaic_0001>
module attributes {stable_mosaic.version = 11 : i64} {
  func.func @mlp_kernel(%arg0: i32, %arg1: memref<128xf32, #tpu.memory_space<smem>>, %arg2: memref<80x128xf32, #tpu.memory_space<vmem>>, %arg3: memref<8x128xf32, #tpu.memory_space<vmem>>) attributes {dimension_semantics = [#tpu.dimension_semantics<parallel>], iteration_bounds = array<i64: 1>, scalar_prefetch = 0 : i64, scratch_operands = 0 : i64, tpu.core_type = #tpu.core_type<tc>, window_params = [{transform_indices = @transform_0, window_bounds = array<i64: 128>}, {transform_indices = @transform_1, window_bounds = array<i64: 80, 128>}, {transform_indices = @transform_2, window_bounds = array<i64: 8, 128>}]} {
    %c0 = arith.constant 0 : index
    %c0_0 = arith.constant 0 : index
    %0 = vector.load %arg2[%c0, %c0_0] : memref<80x128xf32, #tpu.memory_space<vmem>>, vector<8x128xf32>
    %c8 = arith.constant 8 : index
    %c0_1 = arith.constant 0 : index
    %1 = vector.load %arg2[%c8, %c0_1] : memref<80x128xf32, #tpu.memory_space<vmem>>, vector<8x128xf32>
    %c16 = arith.constant 16 : index
    %c0_2 = arith.constant 0 : index
    %2 = vector.load %arg2[%c16, %c0_2] : memref<80x128xf32, #tpu.memory_space<vmem>>, vector<8x128xf32>
    %c24 = arith.constant 24 : index
    %c0_3 = arith.constant 0 : index
    %3 = vector.load %arg2[%c24, %c0_3] : memref<80x128xf32, #tpu.memory_space<vmem>>, vector<8x128xf32>
    %c32 = arith.constant 32 : index
    %c0_4 = arith.constant 0 : index
    %4 = vector.load %arg2[%c32, %c0_4] : memref<80x128xf32, #tpu.memory_space<vmem>>, vector<8x128xf32>
    %c40 = arith.constant 40 : index
    %c0_5 = arith.constant 0 : index
    %5 = vector.load %arg2[%c40, %c0_5] : memref<80x128xf32, #tpu.memory_space<vmem>>, vector<8x128xf32>
    %c48 = arith.constant 48 : index
    %c0_6 = arith.constant 0 : index
    %6 = vector.load %arg2[%c48, %c0_6] : memref<80x128xf32, #tpu.memory_space<vmem>>, vector<8x128xf32>
    %c56 = arith.constant 56 : index
    %c0_7 = arith.constant 0 : index
    %7 = vector.load %arg2[%c56, %c0_7] : memref<80x128xf32, #tpu.memory_space<vmem>>, vector<8x128xf32>
    %c64 = arith.constant 64 : index
    %c0_8 = arith.constant 0 : index
    %8 = vector.load %arg2[%c64, %c0_8] : memref<80x128xf32, #tpu.memory_space<vmem>>, vector<8x128xf32>
    %c72 = arith.constant 72 : index
    %c0_9 = arith.constant 0 : index
    %9 = vector.load %arg2[%c72, %c0_9] : memref<80x128xf32, #tpu.memory_space<vmem>>, vector<8x128xf32>
    %c0_10 = arith.constant 0 : index
    %10 = memref.load %arg1[%c0_10] : memref<128xf32, #tpu.memory_space<smem>>
    %11 = vector.broadcast %10 : f32 to vector<8x128xf32>
    %12 = arith.mulf %0, %11 : vector<8x128xf32>
    %c1 = arith.constant 1 : index
    %13 = memref.load %arg1[%c1] : memref<128xf32, #tpu.memory_space<smem>>
    %14 = vector.broadcast %13 : f32 to vector<8x128xf32>
    %15 = arith.mulf %1, %14 : vector<8x128xf32>
    %16 = arith.addf %12, %15 : vector<8x128xf32>
    %c2 = arith.constant 2 : index
    %17 = memref.load %arg1[%c2] : memref<128xf32, #tpu.memory_space<smem>>
    %18 = vector.broadcast %17 : f32 to vector<8x128xf32>
    %19 = arith.mulf %2, %18 : vector<8x128xf32>
    %20 = arith.addf %16, %19 : vector<8x128xf32>
    %c3 = arith.constant 3 : index
    %21 = memref.load %arg1[%c3] : memref<128xf32, #tpu.memory_space<smem>>
    %22 = vector.broadcast %21 : f32 to vector<8x128xf32>
    %23 = arith.mulf %3, %22 : vector<8x128xf32>
    %24 = arith.addf %20, %23 : vector<8x128xf32>
    %c4 = arith.constant 4 : index
    %25 = memref.load %arg1[%c4] : memref<128xf32, #tpu.memory_space<smem>>
    %26 = vector.broadcast %25 : f32 to vector<8x128xf32>
    %27 = arith.mulf %4, %26 : vector<8x128xf32>
    %28 = arith.addf %24, %27 : vector<8x128xf32>
    %c5 = arith.constant 5 : index
    %29 = memref.load %arg1[%c5] : memref<128xf32, #tpu.memory_space<smem>>
    %30 = vector.broadcast %29 : f32 to vector<8x128xf32>
    %31 = arith.mulf %5, %30 : vector<8x128xf32>
    %32 = arith.addf %28, %31 : vector<8x128xf32>
    %c6 = arith.constant 6 : index
    %33 = memref.load %arg1[%c6] : memref<128xf32, #tpu.memory_space<smem>>
    %34 = vector.broadcast %33 : f32 to vector<8x128xf32>
    %35 = arith.mulf %6, %34 : vector<8x128xf32>
    %36 = arith.addf %32, %35 : vector<8x128xf32>
    %c7 = arith.constant 7 : index
    %37 = memref.load %arg1[%c7] : memref<128xf32, #tpu.memory_space<smem>>
    %38 = vector.broadcast %37 : f32 to vector<8x128xf32>
    %39 = arith.mulf %7, %38 : vector<8x128xf32>
    %40 = arith.addf %36, %39 : vector<8x128xf32>
    %c8_11 = arith.constant 8 : index
    %41 = memref.load %arg1[%c8_11] : memref<128xf32, #tpu.memory_space<smem>>
    %42 = vector.broadcast %41 : f32 to vector<8x128xf32>
    %43 = arith.mulf %8, %42 : vector<8x128xf32>
    %44 = arith.addf %40, %43 : vector<8x128xf32>
    %c9 = arith.constant 9 : index
    %45 = memref.load %arg1[%c9] : memref<128xf32, #tpu.memory_space<smem>>
    %46 = vector.broadcast %45 : f32 to vector<8x128xf32>
    %47 = arith.mulf %9, %46 : vector<8x128xf32>
    %48 = arith.addf %44, %47 : vector<8x128xf32>
    %c50 = arith.constant 50 : index
    %49 = memref.load %arg1[%c50] : memref<128xf32, #tpu.memory_space<smem>>
    %50 = vector.broadcast %49 : f32 to vector<8x128xf32>
    %51 = arith.addf %48, %50 : vector<8x128xf32>
    %cst = arith.constant 0.000000e+00 : f32
    %52 = vector.broadcast %cst : f32 to vector<8x128xf32>
    %53 = arith.maximumf %51, %52 : vector<8x128xf32>
    %c10 = arith.constant 10 : index
    %54 = memref.load %arg1[%c10] : memref<128xf32, #tpu.memory_space<smem>>
    %55 = vector.broadcast %54 : f32 to vector<8x128xf32>
    %56 = arith.mulf %0, %55 : vector<8x128xf32>
    %c11 = arith.constant 11 : index
    %57 = memref.load %arg1[%c11] : memref<128xf32, #tpu.memory_space<smem>>
    %58 = vector.broadcast %57 : f32 to vector<8x128xf32>
    %59 = arith.mulf %1, %58 : vector<8x128xf32>
    %60 = arith.addf %56, %59 : vector<8x128xf32>
    %c12 = arith.constant 12 : index
    %61 = memref.load %arg1[%c12] : memref<128xf32, #tpu.memory_space<smem>>
    %62 = vector.broadcast %61 : f32 to vector<8x128xf32>
    %63 = arith.mulf %2, %62 : vector<8x128xf32>
    %64 = arith.addf %60, %63 : vector<8x128xf32>
    %c13 = arith.constant 13 : index
    %65 = memref.load %arg1[%c13] : memref<128xf32, #tpu.memory_space<smem>>
    %66 = vector.broadcast %65 : f32 to vector<8x128xf32>
    %67 = arith.mulf %3, %66 : vector<8x128xf32>
    %68 = arith.addf %64, %67 : vector<8x128xf32>
    %c14 = arith.constant 14 : index
    %69 = memref.load %arg1[%c14] : memref<128xf32, #tpu.memory_space<smem>>
    %70 = vector.broadcast %69 : f32 to vector<8x128xf32>
    %71 = arith.mulf %4, %70 : vector<8x128xf32>
    %72 = arith.addf %68, %71 : vector<8x128xf32>
    %c15 = arith.constant 15 : index
    %73 = memref.load %arg1[%c15] : memref<128xf32, #tpu.memory_space<smem>>
    %74 = vector.broadcast %73 : f32 to vector<8x128xf32>
    %75 = arith.mulf %5, %74 : vector<8x128xf32>
    %76 = arith.addf %72, %75 : vector<8x128xf32>
    %c16_12 = arith.constant 16 : index
    %77 = memref.load %arg1[%c16_12] : memref<128xf32, #tpu.memory_space<smem>>
    %78 = vector.broadcast %77 : f32 to vector<8x128xf32>
    %79 = arith.mulf %6, %78 : vector<8x128xf32>
    %80 = arith.addf %76, %79 : vector<8x128xf32>
    %c17 = arith.constant 17 : index
    %81 = memref.load %arg1[%c17] : memref<128xf32, #tpu.memory_space<smem>>
    %82 = vector.broadcast %81 : f32 to vector<8x128xf32>
    %83 = arith.mulf %7, %82 : vector<8x128xf32>
    %84 = arith.addf %80, %83 : vector<8x128xf32>
    %c18 = arith.constant 18 : index
    %85 = memref.load %arg1[%c18] : memref<128xf32, #tpu.memory_space<smem>>
    %86 = vector.broadcast %85 : f32 to vector<8x128xf32>
    %87 = arith.mulf %8, %86 : vector<8x128xf32>
    %88 = arith.addf %84, %87 : vector<8x128xf32>
    %c19 = arith.constant 19 : index
    %89 = memref.load %arg1[%c19] : memref<128xf32, #tpu.memory_space<smem>>
    %90 = vector.broadcast %89 : f32 to vector<8x128xf32>
    %91 = arith.mulf %9, %90 : vector<8x128xf32>
    %92 = arith.addf %88, %91 : vector<8x128xf32>
    %c51 = arith.constant 51 : index
    %93 = memref.load %arg1[%c51] : memref<128xf32, #tpu.memory_space<smem>>
    %94 = vector.broadcast %93 : f32 to vector<8x128xf32>
    %95 = arith.addf %92, %94 : vector<8x128xf32>
    %cst_13 = arith.constant 0.000000e+00 : f32
    %96 = vector.broadcast %cst_13 : f32 to vector<8x128xf32>
    %97 = arith.maximumf %95, %96 : vector<8x128xf32>
    %c20 = arith.constant 20 : index
    %98 = memref.load %arg1[%c20] : memref<128xf32, #tpu.memory_space<smem>>
    %99 = vector.broadcast %98 : f32 to vector<8x128xf32>
    %100 = arith.mulf %0, %99 : vector<8x128xf32>
    %c21 = arith.constant 21 : index
    %101 = memref.load %arg1[%c21] : memref<128xf32, #tpu.memory_space<smem>>
    %102 = vector.broadcast %101 : f32 to vector<8x128xf32>
    %103 = arith.mulf %1, %102 : vector<8x128xf32>
    %104 = arith.addf %100, %103 : vector<8x128xf32>
    %c22 = arith.constant 22 : index
    %105 = memref.load %arg1[%c22] : memref<128xf32, #tpu.memory_space<smem>>
    %106 = vector.broadcast %105 : f32 to vector<8x128xf32>
    %107 = arith.mulf %2, %106 : vector<8x128xf32>
    %108 = arith.addf %104, %107 : vector<8x128xf32>
    %c23 = arith.constant 23 : index
    %109 = memref.load %arg1[%c23] : memref<128xf32, #tpu.memory_space<smem>>
    %110 = vector.broadcast %109 : f32 to vector<8x128xf32>
    %111 = arith.mulf %3, %110 : vector<8x128xf32>
    %112 = arith.addf %108, %111 : vector<8x128xf32>
    %c24_14 = arith.constant 24 : index
    %113 = memref.load %arg1[%c24_14] : memref<128xf32, #tpu.memory_space<smem>>
    %114 = vector.broadcast %113 : f32 to vector<8x128xf32>
    %115 = arith.mulf %4, %114 : vector<8x128xf32>
    %116 = arith.addf %112, %115 : vector<8x128xf32>
    %c25 = arith.constant 25 : index
    %117 = memref.load %arg1[%c25] : memref<128xf32, #tpu.memory_space<smem>>
    %118 = vector.broadcast %117 : f32 to vector<8x128xf32>
    %119 = arith.mulf %5, %118 : vector<8x128xf32>
    %120 = arith.addf %116, %119 : vector<8x128xf32>
    %c26 = arith.constant 26 : index
    %121 = memref.load %arg1[%c26] : memref<128xf32, #tpu.memory_space<smem>>
    %122 = vector.broadcast %121 : f32 to vector<8x128xf32>
    %123 = arith.mulf %6, %122 : vector<8x128xf32>
    %124 = arith.addf %120, %123 : vector<8x128xf32>
    %c27 = arith.constant 27 : index
    %125 = memref.load %arg1[%c27] : memref<128xf32, #tpu.memory_space<smem>>
    %126 = vector.broadcast %125 : f32 to vector<8x128xf32>
    %127 = arith.mulf %7, %126 : vector<8x128xf32>
    %128 = arith.addf %124, %127 : vector<8x128xf32>
    %c28 = arith.constant 28 : index
    %129 = memref.load %arg1[%c28] : memref<128xf32, #tpu.memory_space<smem>>
    %130 = vector.broadcast %129 : f32 to vector<8x128xf32>
    %131 = arith.mulf %8, %130 : vector<8x128xf32>
    %132 = arith.addf %128, %131 : vector<8x128xf32>
    %c29 = arith.constant 29 : index
    %133 = memref.load %arg1[%c29] : memref<128xf32, #tpu.memory_space<smem>>
    %134 = vector.broadcast %133 : f32 to vector<8x128xf32>
    %135 = arith.mulf %9, %134 : vector<8x128xf32>
    %136 = arith.addf %132, %135 : vector<8x128xf32>
    %c52 = arith.constant 52 : index
    %137 = memref.load %arg1[%c52] : memref<128xf32, #tpu.memory_space<smem>>
    %138 = vector.broadcast %137 : f32 to vector<8x128xf32>
    %139 = arith.addf %136, %138 : vector<8x128xf32>
    %cst_15 = arith.constant 0.000000e+00 : f32
    %140 = vector.broadcast %cst_15 : f32 to vector<8x128xf32>
    %141 = arith.maximumf %139, %140 : vector<8x128xf32>
    %c30 = arith.constant 30 : index
    %142 = memref.load %arg1[%c30] : memref<128xf32, #tpu.memory_space<smem>>
    %143 = vector.broadcast %142 : f32 to vector<8x128xf32>
    %144 = arith.mulf %0, %143 : vector<8x128xf32>
    %c31 = arith.constant 31 : index
    %145 = memref.load %arg1[%c31] : memref<128xf32, #tpu.memory_space<smem>>
    %146 = vector.broadcast %145 : f32 to vector<8x128xf32>
    %147 = arith.mulf %1, %146 : vector<8x128xf32>
    %148 = arith.addf %144, %147 : vector<8x128xf32>
    %c32_16 = arith.constant 32 : index
    %149 = memref.load %arg1[%c32_16] : memref<128xf32, #tpu.memory_space<smem>>
    %150 = vector.broadcast %149 : f32 to vector<8x128xf32>
    %151 = arith.mulf %2, %150 : vector<8x128xf32>
    %152 = arith.addf %148, %151 : vector<8x128xf32>
    %c33 = arith.constant 33 : index
    %153 = memref.load %arg1[%c33] : memref<128xf32, #tpu.memory_space<smem>>
    %154 = vector.broadcast %153 : f32 to vector<8x128xf32>
    %155 = arith.mulf %3, %154 : vector<8x128xf32>
    %156 = arith.addf %152, %155 : vector<8x128xf32>
    %c34 = arith.constant 34 : index
    %157 = memref.load %arg1[%c34] : memref<128xf32, #tpu.memory_space<smem>>
    %158 = vector.broadcast %157 : f32 to vector<8x128xf32>
    %159 = arith.mulf %4, %158 : vector<8x128xf32>
    %160 = arith.addf %156, %159 : vector<8x128xf32>
    %c35 = arith.constant 35 : index
    %161 = memref.load %arg1[%c35] : memref<128xf32, #tpu.memory_space<smem>>
    %162 = vector.broadcast %161 : f32 to vector<8x128xf32>
    %163 = arith.mulf %5, %162 : vector<8x128xf32>
    %164 = arith.addf %160, %163 : vector<8x128xf32>
    %c36 = arith.constant 36 : index
    %165 = memref.load %arg1[%c36] : memref<128xf32, #tpu.memory_space<smem>>
    %166 = vector.broadcast %165 : f32 to vector<8x128xf32>
    %167 = arith.mulf %6, %166 : vector<8x128xf32>
    %168 = arith.addf %164, %167 : vector<8x128xf32>
    %c37 = arith.constant 37 : index
    %169 = memref.load %arg1[%c37] : memref<128xf32, #tpu.memory_space<smem>>
    %170 = vector.broadcast %169 : f32 to vector<8x128xf32>
    %171 = arith.mulf %7, %170 : vector<8x128xf32>
    %172 = arith.addf %168, %171 : vector<8x128xf32>
    %c38 = arith.constant 38 : index
    %173 = memref.load %arg1[%c38] : memref<128xf32, #tpu.memory_space<smem>>
    %174 = vector.broadcast %173 : f32 to vector<8x128xf32>
    %175 = arith.mulf %8, %174 : vector<8x128xf32>
    %176 = arith.addf %172, %175 : vector<8x128xf32>
    %c39 = arith.constant 39 : index
    %177 = memref.load %arg1[%c39] : memref<128xf32, #tpu.memory_space<smem>>
    %178 = vector.broadcast %177 : f32 to vector<8x128xf32>
    %179 = arith.mulf %9, %178 : vector<8x128xf32>
    %180 = arith.addf %176, %179 : vector<8x128xf32>
    %c53 = arith.constant 53 : index
    %181 = memref.load %arg1[%c53] : memref<128xf32, #tpu.memory_space<smem>>
    %182 = vector.broadcast %181 : f32 to vector<8x128xf32>
    %183 = arith.addf %180, %182 : vector<8x128xf32>
    %cst_17 = arith.constant 0.000000e+00 : f32
    %184 = vector.broadcast %cst_17 : f32 to vector<8x128xf32>
    %185 = arith.maximumf %183, %184 : vector<8x128xf32>
    %c40_18 = arith.constant 40 : index
    %186 = memref.load %arg1[%c40_18] : memref<128xf32, #tpu.memory_space<smem>>
    %187 = vector.broadcast %186 : f32 to vector<8x128xf32>
    %188 = arith.mulf %0, %187 : vector<8x128xf32>
    %c41 = arith.constant 41 : index
    %189 = memref.load %arg1[%c41] : memref<128xf32, #tpu.memory_space<smem>>
    %190 = vector.broadcast %189 : f32 to vector<8x128xf32>
    %191 = arith.mulf %1, %190 : vector<8x128xf32>
    %192 = arith.addf %188, %191 : vector<8x128xf32>
    %c42 = arith.constant 42 : index
    %193 = memref.load %arg1[%c42] : memref<128xf32, #tpu.memory_space<smem>>
    %194 = vector.broadcast %193 : f32 to vector<8x128xf32>
    %195 = arith.mulf %2, %194 : vector<8x128xf32>
    %196 = arith.addf %192, %195 : vector<8x128xf32>
    %c43 = arith.constant 43 : index
    %197 = memref.load %arg1[%c43] : memref<128xf32, #tpu.memory_space<smem>>
    %198 = vector.broadcast %197 : f32 to vector<8x128xf32>
    %199 = arith.mulf %3, %198 : vector<8x128xf32>
    %200 = arith.addf %196, %199 : vector<8x128xf32>
    %c44 = arith.constant 44 : index
    %201 = memref.load %arg1[%c44] : memref<128xf32, #tpu.memory_space<smem>>
    %202 = vector.broadcast %201 : f32 to vector<8x128xf32>
    %203 = arith.mulf %4, %202 : vector<8x128xf32>
    %204 = arith.addf %200, %203 : vector<8x128xf32>
    %c45 = arith.constant 45 : index
    %205 = memref.load %arg1[%c45] : memref<128xf32, #tpu.memory_space<smem>>
    %206 = vector.broadcast %205 : f32 to vector<8x128xf32>
    %207 = arith.mulf %5, %206 : vector<8x128xf32>
    %208 = arith.addf %204, %207 : vector<8x128xf32>
    %c46 = arith.constant 46 : index
    %209 = memref.load %arg1[%c46] : memref<128xf32, #tpu.memory_space<smem>>
    %210 = vector.broadcast %209 : f32 to vector<8x128xf32>
    %211 = arith.mulf %6, %210 : vector<8x128xf32>
    %212 = arith.addf %208, %211 : vector<8x128xf32>
    %c47 = arith.constant 47 : index
    %213 = memref.load %arg1[%c47] : memref<128xf32, #tpu.memory_space<smem>>
    %214 = vector.broadcast %213 : f32 to vector<8x128xf32>
    %215 = arith.mulf %7, %214 : vector<8x128xf32>
    %216 = arith.addf %212, %215 : vector<8x128xf32>
    %c48_19 = arith.constant 48 : index
    %217 = memref.load %arg1[%c48_19] : memref<128xf32, #tpu.memory_space<smem>>
    %218 = vector.broadcast %217 : f32 to vector<8x128xf32>
    %219 = arith.mulf %8, %218 : vector<8x128xf32>
    %220 = arith.addf %216, %219 : vector<8x128xf32>
    %c49 = arith.constant 49 : index
    %221 = memref.load %arg1[%c49] : memref<128xf32, #tpu.memory_space<smem>>
    %222 = vector.broadcast %221 : f32 to vector<8x128xf32>
    %223 = arith.mulf %9, %222 : vector<8x128xf32>
    %224 = arith.addf %220, %223 : vector<8x128xf32>
    %c54 = arith.constant 54 : index
    %225 = memref.load %arg1[%c54] : memref<128xf32, #tpu.memory_space<smem>>
    %226 = vector.broadcast %225 : f32 to vector<8x128xf32>
    %227 = arith.addf %224, %226 : vector<8x128xf32>
    %cst_20 = arith.constant 0.000000e+00 : f32
    %228 = vector.broadcast %cst_20 : f32 to vector<8x128xf32>
    %229 = arith.maximumf %227, %228 : vector<8x128xf32>
    %c55 = arith.constant 55 : index
    %230 = memref.load %arg1[%c55] : memref<128xf32, #tpu.memory_space<smem>>
    %231 = vector.broadcast %230 : f32 to vector<8x128xf32>
    %232 = arith.mulf %53, %231 : vector<8x128xf32>
    %c56_21 = arith.constant 56 : index
    %233 = memref.load %arg1[%c56_21] : memref<128xf32, #tpu.memory_space<smem>>
    %234 = vector.broadcast %233 : f32 to vector<8x128xf32>
    %235 = arith.mulf %97, %234 : vector<8x128xf32>
    %236 = arith.addf %232, %235 : vector<8x128xf32>
    %c57 = arith.constant 57 : index
    %237 = memref.load %arg1[%c57] : memref<128xf32, #tpu.memory_space<smem>>
    %238 = vector.broadcast %237 : f32 to vector<8x128xf32>
    %239 = arith.mulf %141, %238 : vector<8x128xf32>
    %240 = arith.addf %236, %239 : vector<8x128xf32>
    %c58 = arith.constant 58 : index
    %241 = memref.load %arg1[%c58] : memref<128xf32, #tpu.memory_space<smem>>
    %242 = vector.broadcast %241 : f32 to vector<8x128xf32>
    %243 = arith.mulf %185, %242 : vector<8x128xf32>
    %244 = arith.addf %240, %243 : vector<8x128xf32>
    %c59 = arith.constant 59 : index
    %245 = memref.load %arg1[%c59] : memref<128xf32, #tpu.memory_space<smem>>
    %246 = vector.broadcast %245 : f32 to vector<8x128xf32>
    %247 = arith.mulf %229, %246 : vector<8x128xf32>
    %248 = arith.addf %244, %247 : vector<8x128xf32>
    %c70 = arith.constant 70 : index
    %249 = memref.load %arg1[%c70] : memref<128xf32, #tpu.memory_space<smem>>
    %250 = vector.broadcast %249 : f32 to vector<8x128xf32>
    %251 = arith.addf %248, %250 : vector<8x128xf32>
    %cst_22 = arith.constant 0.000000e+00 : f32
    %252 = vector.broadcast %cst_22 : f32 to vector<8x128xf32>
    %253 = arith.maximumf %251, %252 : vector<8x128xf32>
    %c60 = arith.constant 60 : index
    %254 = memref.load %arg1[%c60] : memref<128xf32, #tpu.memory_space<smem>>
    %255 = vector.broadcast %254 : f32 to vector<8x128xf32>
    %256 = arith.mulf %53, %255 : vector<8x128xf32>
    %c61 = arith.constant 61 : index
    %257 = memref.load %arg1[%c61] : memref<128xf32, #tpu.memory_space<smem>>
    %258 = vector.broadcast %257 : f32 to vector<8x128xf32>
    %259 = arith.mulf %97, %258 : vector<8x128xf32>
    %260 = arith.addf %256, %259 : vector<8x128xf32>
    %c62 = arith.constant 62 : index
    %261 = memref.load %arg1[%c62] : memref<128xf32, #tpu.memory_space<smem>>
    %262 = vector.broadcast %261 : f32 to vector<8x128xf32>
    %263 = arith.mulf %141, %262 : vector<8x128xf32>
    %264 = arith.addf %260, %263 : vector<8x128xf32>
    %c63 = arith.constant 63 : index
    %265 = memref.load %arg1[%c63] : memref<128xf32, #tpu.memory_space<smem>>
    %266 = vector.broadcast %265 : f32 to vector<8x128xf32>
    %267 = arith.mulf %185, %266 : vector<8x128xf32>
    %268 = arith.addf %264, %267 : vector<8x128xf32>
    %c64_23 = arith.constant 64 : index
    %269 = memref.load %arg1[%c64_23] : memref<128xf32, #tpu.memory_space<smem>>
    %270 = vector.broadcast %269 : f32 to vector<8x128xf32>
    %271 = arith.mulf %229, %270 : vector<8x128xf32>
    %272 = arith.addf %268, %271 : vector<8x128xf32>
    %c71 = arith.constant 71 : index
    %273 = memref.load %arg1[%c71] : memref<128xf32, #tpu.memory_space<smem>>
    %274 = vector.broadcast %273 : f32 to vector<8x128xf32>
    %275 = arith.addf %272, %274 : vector<8x128xf32>
    %cst_24 = arith.constant 0.000000e+00 : f32
    %276 = vector.broadcast %cst_24 : f32 to vector<8x128xf32>
    %277 = arith.maximumf %275, %276 : vector<8x128xf32>
    %c65 = arith.constant 65 : index
    %278 = memref.load %arg1[%c65] : memref<128xf32, #tpu.memory_space<smem>>
    %279 = vector.broadcast %278 : f32 to vector<8x128xf32>
    %280 = arith.mulf %53, %279 : vector<8x128xf32>
    %c66 = arith.constant 66 : index
    %281 = memref.load %arg1[%c66] : memref<128xf32, #tpu.memory_space<smem>>
    %282 = vector.broadcast %281 : f32 to vector<8x128xf32>
    %283 = arith.mulf %97, %282 : vector<8x128xf32>
    %284 = arith.addf %280, %283 : vector<8x128xf32>
    %c67 = arith.constant 67 : index
    %285 = memref.load %arg1[%c67] : memref<128xf32, #tpu.memory_space<smem>>
    %286 = vector.broadcast %285 : f32 to vector<8x128xf32>
    %287 = arith.mulf %141, %286 : vector<8x128xf32>
    %288 = arith.addf %284, %287 : vector<8x128xf32>
    %c68 = arith.constant 68 : index
    %289 = memref.load %arg1[%c68] : memref<128xf32, #tpu.memory_space<smem>>
    %290 = vector.broadcast %289 : f32 to vector<8x128xf32>
    %291 = arith.mulf %185, %290 : vector<8x128xf32>
    %292 = arith.addf %288, %291 : vector<8x128xf32>
    %c69 = arith.constant 69 : index
    %293 = memref.load %arg1[%c69] : memref<128xf32, #tpu.memory_space<smem>>
    %294 = vector.broadcast %293 : f32 to vector<8x128xf32>
    %295 = arith.mulf %229, %294 : vector<8x128xf32>
    %296 = arith.addf %292, %295 : vector<8x128xf32>
    %c72_25 = arith.constant 72 : index
    %297 = memref.load %arg1[%c72_25] : memref<128xf32, #tpu.memory_space<smem>>
    %298 = vector.broadcast %297 : f32 to vector<8x128xf32>
    %299 = arith.addf %296, %298 : vector<8x128xf32>
    %cst_26 = arith.constant 0.000000e+00 : f32
    %300 = vector.broadcast %cst_26 : f32 to vector<8x128xf32>
    %301 = arith.maximumf %299, %300 : vector<8x128xf32>
    %c73 = arith.constant 73 : index
    %302 = memref.load %arg1[%c73] : memref<128xf32, #tpu.memory_space<smem>>
    %303 = vector.broadcast %302 : f32 to vector<8x128xf32>
    %304 = arith.mulf %253, %303 : vector<8x128xf32>
    %c74 = arith.constant 74 : index
    %305 = memref.load %arg1[%c74] : memref<128xf32, #tpu.memory_space<smem>>
    %306 = vector.broadcast %305 : f32 to vector<8x128xf32>
    %307 = arith.mulf %277, %306 : vector<8x128xf32>
    %308 = arith.addf %304, %307 : vector<8x128xf32>
    %c75 = arith.constant 75 : index
    %309 = memref.load %arg1[%c75] : memref<128xf32, #tpu.memory_space<smem>>
    %310 = vector.broadcast %309 : f32 to vector<8x128xf32>
    %311 = arith.mulf %301, %310 : vector<8x128xf32>
    %312 = arith.addf %308, %311 : vector<8x128xf32>
    %c76 = arith.constant 76 : index
    %313 = memref.load %arg1[%c76] : memref<128xf32, #tpu.memory_space<smem>>
    %314 = vector.broadcast %313 : f32 to vector<8x128xf32>
    %315 = arith.addf %312, %314 : vector<8x128xf32>
    %cst_27 = arith.constant 5.000000e-01 : f32
    %316 = vector.broadcast %cst_27 : f32 to vector<8x128xf32>
    %317 = arith.mulf %316, %315 : vector<8x128xf32>
    %318 = math.tanh %317 : vector<8x128xf32>
    %cst_28 = arith.constant 5.000000e-01 : f32
    %319 = vector.broadcast %cst_28 : f32 to vector<8x128xf32>
    %320 = arith.mulf %319, %318 : vector<8x128xf32>
    %cst_29 = arith.constant 5.000000e-01 : f32
    %321 = vector.broadcast %cst_29 : f32 to vector<8x128xf32>
    %322 = arith.addf %320, %321 : vector<8x128xf32>
    %c0_30 = arith.constant 0 : index
    %c0_31 = arith.constant 0 : index
    %323 = vector.load %arg3[%c0_30, %c0_31] : memref<8x128xf32, #tpu.memory_space<vmem>>, vector<8x128xf32>
    tpu.vector_store %arg3[%c0_30, %c0_31], %322 {strides = array<i32>} : memref<8x128xf32, #tpu.memory_space<vmem>>, vector<8x128xf32>,
    return
  }
  func.func @transform_0(%arg0: i32) -> i32 {
    %c0_i32 = arith.constant 0 : i32
    %c0_i32_0 = arith.constant 0 : i32
    return %c0_i32 : i32
  }
  func.func @transform_1(%arg0: i32) -> (i32, i32) {
    %c0_i32 = arith.constant 0 : i32
    %c0_i32_0 = arith.constant 0 : i32
    return %c0_i32, %arg0 : i32, i32
  }
  func.func @transform_2(%arg0: i32) -> (i32, i32) {
    %c0_i32 = arith.constant 0 : i32
    %c0_i32_0 = arith.constant 0 : i32
    return %c0_i32, %arg0 : i32, i32
  }
}

</mosaic_0001>

<bundles_post_ra>
// kernel: tpu_custom_call.1
= control target key start
LH: loop header
LB: loop body
LE: loop exit
PB: predicated region body
PF: predicated region fallthrough
CT: control target
= control target key end

     0   :  { %7 = vsyncpa [#allocation5], 0  ;;  %s752_s0 = inlined_call_operand.hbm [shape: f32[128], index: 0, kind: input, shape index: {}]   ;;  %s753_s1 = inlined_call_operand.hbm [shape: f32[80,128], index: 1, kind: input, shape index: {}]   ;;  %s754_s2 = inlined_call_operand.hbm [shape: f32[8,128], index: 2, kind: output, shape index: {}]  }
   0x1   :  { %8 = vsyncpa [#allocation3], 0 }
   0x2   :  { %9 = vsyncpa [#allocation4], 0  ;;  %s503_s9 = smov [#allocation2]   ;;  %s504_s12 = smov [#allocation6]  }
   0x3   :  { %17 = dma.hbm_to_smem %s752_s0, 16, %s503_s9, [#allocation5]  }
   0x4   :  { %s23_s13 = sshll.u32 %s504_s12, 4  ;;  %s24_s13 = int_to_ptr.vmem [resolvable:$true] %s23_s13 }
   0x5   :  { %s465_s14 = scalar_lea.vmem %s24_s13, 1280  ;;  %p470_p1 = scmp.lt.s32.totalorder %s24_s13, %s24_s13 }
   0x6   :  { %p466_p0 = scmp.ne.s32.totalorder %s24_s13, %s465_s14  ;;  %p471_p2 = scmp.lt.s32.totalorder %s465_s14, %s465_s14 }
   0x8   :  { %p472_p3 = por %p471_p2, %p470_p1 }
   0xa   :  { %p473_p4 = pnand %p472_p3, %p466_p0 }
   0xc   :  { %476 = shalt.err (!%p473_p4)
}
   0xd   :  { %s505_s15 = smov 128   ;;  %s506_s16 = smov 8  }
   0xe   :  { %29 = dma.hbm_to_vmem [thread:$0]  %s753_s1, 1280, %s24_s13, [#allocation3], %s505_s15, %s505_s15, %s506_s16  }
   0xf   :  { %497 = dma.done.wait [#allocation5], 16  }
  0x10   :  { %498 = vsyncadd [#allocation5], 4294967280 }
  0x11   :  { %499 = dma.done.wait [#allocation3], 1280  }
  0x12   :  { %500 = vsyncadd [#allocation3], 4294966016 }
  0x13   :  { %36 = sfence }
  0x14   :  { %s47_s0 = sld [smem:[#allocation2]]  ;;  %v529_v0 = vld [vmem:[#allocation6] sm:$0xff]  ;;  %v533_v1 = vld [vmem:[#allocation6 + $0x8] sm:$0xff]  ;;  %v542_v5 = vld [vmem:[#allocation6 + $0x10] sm:$0xff] }
  0x15   :  { %s366_s19 = sld [smem:[#allocation2 + $0x1]]  ;;  %v552_v10 = vld [vmem:[#allocation6 + $0x18] sm:$0xff]  ;;  %v557_v14 = vld [vmem:[#allocation6 + $0x20] sm:$0xff]  ;;  %v571_v23 = vld [vmem:[#allocation6 + $0x28] sm:$0xff] }
  0x16   :  { %s367_s20 = sld [smem:[#allocation2 + $0x2]]  ;;  %v582_v33 = vld [vmem:[#allocation6 + $0x30] sm:$0xff]  ;;  %v592_v40 = vld [vmem:[#allocation6 + $0x38] sm:$0xff]  ;;  %v609_v54 = vld [vmem:[#allocation6 + $0x40] sm:$0xff] }
  0x17   :  { %s368_s21 = sld [smem:[#allocation2 + $0x3]] }
  0x18   :  { %s531_s22 = sld [smem:[#allocation2 + $0x4]] }
  0x19   :  { %s535_s23 = sld [smem:[#allocation2 + $0x5]] }
  0x1a   :  { %v48_v2 = vstv %s47_s0  ;;  %s537_s24 = sld [smem:[#allocation2 + $0x6]] }
  0x1b   :  { %v49_v3 = vmul.f32 %v48_v2, %v529_v0  ;;  %v51_v4 = vstv %s366_s19  ;;  %s540_s1 = sld [smem:[#allocation2 + $0x7]] }
  0x1c   :  { %v52_v6 = vmul.f32 %v51_v4, %v533_v1  ;;  %v55_v7 = vstv %s367_s20  ;;  %s545_s25 = sld [smem:[#allocation2 + $0x8]] }
  0x1d   :  { %s547_s26 = sld [smem:[#allocation2 + $0x9]]  ;;  %v56_v9 = vmul.f32 %v55_v7, %v542_v5  ;;  %v59_v11 = vstv %s368_s21  ;;  %v622_v7 = vld [vmem:[#allocation6 + $0x48] sm:$0xff] }
  0x1e   :  { %s549_s27 = sld [smem:[#allocation2 + $0x32]]  ;;  %v53_v8 = vadd.f32 %v52_v6, %v49_v3  ;;  %v60_v13 = vmul.f32 %v59_v11, %v552_v10  ;;  %v63_v15 = vstv %s531_s22 }
  0x1f   :  { %s376_s28 = sld [smem:[#allocation2 + $0xa]]  ;;  %v64_v20 = vmul.f32 %v63_v15, %v557_v14  ;;  %v67_v24 = vstv %s535_s23 }
  0x20   :  { %s377_s29 = sld [smem:[#allocation2 + $0xb]]  ;;  %v57_v12 = vadd.f32 %v56_v9, %v53_v8  ;;  %v68_v30 = vmul.f32 %v67_v24, %v571_v23  ;;  %v71_v34 = vstv %s537_s24 }
  0x21   :  { %s378_s30 = sld [smem:[#allocation2 + $0xc]]  ;;  %v72_v39 = vmul.f32 %v71_v34, %v582_v33  ;;  %v75_v41 = vstv %s540_s1 }
  0x22   :  { %s379_s3 = sld [smem:[#allocation2 + $0xd]]  ;;  %v61_v19 = vadd.f32 %v60_v13, %v57_v12  ;;  %v76_v51 = vmul.f32 %v75_v41, %v592_v40  ;;  %v79_v55 = vstv %s545_s25 }
  0x23   :  { %s555_s4 = sld [smem:[#allocation2 + $0xe]]  ;;  %v80_v4 = vmul.f32 %v79_v55, %v609_v54  ;;  %v83_v8 = vstv %s547_s26 }
  0x24   :  { %s560_s5 = sld [smem:[#allocation2 + $0xf]]  ;;  %v65_v29 = vadd.f32 %v64_v20, %v61_v19  ;;  %v84_v20 = vmul.f32 %v83_v8, %v622_v7 }
  0x25   :  { %v91_v16 = vstv %s376_s28  ;;  %s562_s6 = sld [smem:[#allocation2 + $0x10]] }
  0x26   :  { %v92_v17 = vmul.f32 %v91_v16, %v529_v0  ;;  %v94_v18 = vstv %s377_s29  ;;  %s565_s7 = sld [smem:[#allocation2 + $0x11]]  ;;  %v69_v38 = vadd.f32 %v68_v30, %v65_v29 }
  0x27   :  { %v95_v21 = vmul.f32 %v94_v18, %v533_v1  ;;  %v98_v22 = vstv %s378_s30  ;;  %s569_s8 = sld [smem:[#allocation2 + $0x12]] }
  0x28   :  { %v99_v25 = vmul.f32 %v98_v22, %v542_v5  ;;  %v102_v26 = vstv %s379_s3  ;;  %s575_s9 = sld [smem:[#allocation2 + $0x13]]  ;;  %v73_v50 = vadd.f32 %v72_v39, %v69_v38 }
  0x29   :  { %v96_v27 = vadd.f32 %v95_v21, %v92_v17  ;;  %s577_s10 = sld [smem:[#allocation2 + $0x33]]  ;;  %v103_v28 = vmul.f32 %v102_v26, %v552_v10  ;;  %v106_v32 = vstv %s555_s4 }
  0x2a   :  { %s387_s11 = sld [smem:[#allocation2 + $0x14]]  ;;  %v107_v36 = vmul.f32 %v106_v32, %v557_v14  ;;  %v110_v37 = vstv %s560_s5  ;;  %v77_v3 = vadd.f32 %v76_v51, %v73_v50 }
  0x2b   :  { %v100_v31 = vadd.f32 %v99_v25, %v96_v27  ;;  %s388_s12 = sld [smem:[#allocation2 + $0x15]]  ;;  %v111_v43 = vmul.f32 %v110_v37, %v571_v23  ;;  %v114_v47 = vstv %s562_s6 }
  0x2c   :  { %s389_s13 = sld [smem:[#allocation2 + $0x16]]  ;;  %v115_v59 = vmul.f32 %v114_v47, %v582_v33  ;;  %v118_v62 = vstv %s565_s7  ;;  %v81_v19 = vadd.f32 %v80_v4, %v77_v3 }
  0x2d   :  { %s390_s14 = sld [smem:[#allocation2 + $0x17]]  ;;  %v104_v35 = vadd.f32 %v103_v28, %v100_v31  ;;  %v119_v12 = vmul.f32 %v118_v62, %v592_v40  ;;  %v122_v16 = vstv %s569_s8 }
  0x2e   :  { %s587_s15 = sld [smem:[#allocation2 + $0x18]]  ;;  %v123_v27 = vmul.f32 %v122_v16, %v609_v54 }
  0x2f   :  { %s590_s16 = sld [smem:[#allocation2 + $0x19]]  ;;  %v108_v46 = vadd.f32 %v107_v36, %v104_v35  ;;  %v126_v36 = vstv %s575_s9 }
  0x30   :  { %v134_v42 = vstv %s387_s11  ;;  %s595_s17 = sld [smem:[#allocation2 + $0x1a]]  ;;  %v127_v50 = vmul.f32 %v126_v36, %v622_v7 }
  0x31   :  { %v135_v44 = vmul.f32 %v134_v42, %v529_v0  ;;  %v137_v45 = vstv %s388_s12  ;;  %s599_s18 = sld [smem:[#allocation2 + $0x1b]]  ;;  %v112_v61 = vadd.f32 %v111_v43, %v108_v46 }
  0x32   :  { %v138_v48 = vmul.f32 %v137_v45, %v533_v1  ;;  %v141_v49 = vstv %s389_s13  ;;  %s603_s0 = sld [smem:[#allocation2 + $0x1c]] }
  0x33   :  { %v142_v52 = vmul.f32 %v141_v49, %v542_v5  ;;  %v145_v53 = vstv %s390_s14  ;;  %s607_s19 = sld [smem:[#allocation2 + $0x1d]]  ;;  %v116_v15 = vadd.f32 %v115_v59, %v112_v61  ;;  %v130_v59 = vstv %s577_s10 }
  0x34   :  { %v139_v56 = vadd.f32 %v138_v48, %v135_v44  ;;  %v146_v57 = vmul.f32 %v145_v53, %v552_v10  ;;  %v149_v58 = vstv %s587_s15  ;;  %s614_s20 = sld [smem:[#allocation2 + $0x34]]  ;;  %v85_v44 = vadd.f32 %v84_v20, %v81_v19 }
  0x35   :  { %v153_v60 = vstv %s590_s16  ;;  %s398_s21 = sld [smem:[#allocation2 + $0x1e]]  ;;  %v150_v2 = vmul.f32 %v149_v58, %v557_v14  ;;  %v120_v31 = vadd.f32 %v119_v12, %v116_v15  ;;  %v87_v48 = vstv %s549_s27 }
  0x36   :  { %v143_v63 = vadd.f32 %v142_v52, %v139_v56  ;;  %s399_s22 = sld [smem:[#allocation2 + $0x1f]]  ;;  %v157_v6 = vstv %s595_s17  ;;  %v154_v11 = vmul.f32 %v153_v60, %v571_v23  ;;  %v88_v58 = vadd.f32 %v87_v48, %v85_v44 }
  0x37   :  { %s400_s23 = sld [smem:[#allocation2 + $0x20]]  ;;  %v161_v13 = vstv %s599_s18  ;;  %v158_v18 = vmul.f32 %v157_v6, %v582_v33  ;;  %v124_v49 = vadd.f32 %v123_v27, %v120_v31 }
  0x38   :  { %v147_v9 = vadd.f32 %v146_v57, %v143_v63  ;;  %s401_s24 = sld [smem:[#allocation2 + $0x21]]  ;;  %v162_v24 = vmul.f32 %v161_v13, %v592_v40  ;;  %v165_v28 = vstv %s603_s0 }
  0x39   :  { %s628_s1 = sld [smem:[#allocation2 + $0x22]]  ;;  %v166_v42 = vmul.f32 %v165_v28, %v609_v54  ;;  %v169_v45 = vstv %s607_s19  ;;  %v128_v62 = vadd.f32 %v127_v50, %v124_v49  ;;  %v699_v28 = vmax.f32 %v88_v58, 0.0 }
  0x3a   :  { %v151_v17 = vadd.f32 %v150_v2, %v147_v9  ;;  %s632_s25 = sld [smem:[#allocation2 + $0x23]]  ;;  %v170_v56 = vmul.f32 %v169_v45, %v622_v7  ;;  %v173_v63 = vstv %s614_s20 }
  0x3b   :  { %v177_v21 = vstv %s398_s21  ;;  %s635_s26 = sld [smem:[#allocation2 + $0x24]] }
  0x3c   :  { %v155_v22 = vadd.f32 %v154_v11, %v151_v17  ;;  %v178_v25 = vmul.f32 %v177_v21, %v529_v0  ;;  %v180_v26 = vstv %s399_s22  ;;  %s639_s28 = sld [smem:[#allocation2 + $0x25]] }
  0x3d   :  { %v181_v29 = vmul.f32 %v180_v26, %v533_v1  ;;  %v184_v30 = vstv %s400_s23  ;;  %s644_s29 = sld [smem:[#allocation2 + $0x26]] }
  0x3e   :  { %v159_v32 = vadd.f32 %v158_v18, %v155_v22  ;;  %v185_v34 = vmul.f32 %v184_v30, %v542_v5  ;;  %v188_v35 = vstv %s401_s24  ;;  %s647_s30 = sld [smem:[#allocation2 + $0x27]] }
  0x3f   :  { %v182_v37 = vadd.f32 %v181_v29, %v178_v25  ;;  %v189_v38 = vmul.f32 %v188_v35, %v552_v10  ;;  %v192_v39 = vstv %s628_s1  ;;  %s652_s3 = sld [smem:[#allocation2 + $0x35]] }
  0x40   :  { %v163_v41 = vadd.f32 %v162_v24, %v159_v32  ;;  %v196_v43 = vstv %s632_s25  ;;  %s409_s4 = sld [smem:[#allocation2 + $0x28]]  ;;  %v193_v47 = vmul.f32 %v192_v39, %v557_v14 }
  0x41   :  { %v186_v46 = vadd.f32 %v185_v34, %v182_v37  ;;  %s658_s5 = sld [smem:[#allocation2 + $0x29]]  ;;  %v200_v51 = vstv %s635_s26  ;;  %v197_v53 = vmul.f32 %v196_v43, %v571_v23 }
  0x42   :  { %s411_s6 = sld [smem:[#allocation2 + $0x2a]]  ;;  %v167_v55 = vadd.f32 %v166_v42, %v163_v41  ;;  %v204_v57 = vstv %s639_s28  ;;  %v201_v61 = vmul.f32 %v200_v51, %v582_v33 }
  0x43   :  { %v190_v52 = vadd.f32 %v189_v38, %v186_v46  ;;  %s664_s7 = sld [smem:[#allocation2 + $0x2b]]  ;;  %v208_v2 = vstv %s644_s29  ;;  %v205_v6 = vmul.f32 %v204_v57, %v592_v40 }
  0x44   :  { %s668_s8 = sld [smem:[#allocation2 + $0x2c]]  ;;  %v171_v11 = vadd.f32 %v170_v56, %v167_v55  ;;  %v212_v12 = vstv %s647_s30  ;;  %v209_v17 = vmul.f32 %v208_v2, %v609_v54 }
  0x45   :  { %v194_v60 = vadd.f32 %v193_v47, %v190_v52  ;;  %s672_s27 = sld [smem:[#allocation2 + $0x2d]]  ;;  %v213_v24 = vmul.f32 %v212_v12, %v622_v7  ;;  %v216_v30 = vstv %s652_s3 }
  0x46   :  { %v220_v3 = vstv %s409_s4  ;;  %s676_s9 = sld [smem:[#allocation2 + $0x2e]]  ;;  %v174_v26 = vadd.f32 %v173_v63, %v171_v11 }
  0x47   :  { %v198_v4 = vadd.f32 %v197_v53, %v194_v60  ;;  %v221_v8 = vmul.f32 %v220_v3, %v529_v0  ;;  %v223_v9 = vstv %s658_s5  ;;  %s681_s10 = sld [smem:[#allocation2 + $0x2f]] }
  0x48   :  { %v224_v13 = vmul.f32 %v223_v9, %v533_v1  ;;  %v227_v15 = vstv %s411_s6  ;;  %s685_s11 = sld [smem:[#allocation2 + $0x30]]  ;;  %v131_v1 = vadd.f32 %v130_v59, %v128_v62 }
  0x49   :  { %v202_v16 = vadd.f32 %v201_v61, %v198_v4  ;;  %v228_v18 = vmul.f32 %v227_v15, %v542_v5  ;;  %v231_v19 = vstv %s664_s7  ;;  %s690_s12 = sld [smem:[#allocation2 + $0x31]]  ;;  %s507_s7 = smov [#allocation7]  }
  0x4a   :  { %v225_v0 = vadd.f32 %v224_v13, %v221_v8  ;;  %v232_v20 = vmul.f32 %v231_v19, %v552_v10  ;;  %v235_v21 = vstv %s668_s8  ;;  %s694_s13 = sld [smem:[#allocation2 + $0x36]]  ;;  %v709_v35 = vmax.f32 %v131_v1, 0.0  ;;  %s356_s8 = sshll.u32 %s507_s7, 4  ;;  %s357_s8 = int_to_ptr.vmem [resolvable:$true] %s356_s8 }
  0x4b   :  { %v206_v22 = vadd.f32 %v205_v6, %v202_v16  ;;  %v239_v25 = vstv %s672_s27  ;;  %s420_s14 = sld [smem:[#allocation2 + $0x37]]  ;;  %v236_v27 = vmul.f32 %v235_v21, %v557_v14  ;;  %v713_v14 = vmax.f32 %v174_v26, 0.0  ;;  %s477_s27 = scalar_lea.vmem %s357_s8, 128 }
  0x4c   :  { %v229_v5 = vadd.f32 %v228_v18, %v225_v0  ;;  %s421_s15 = sld [smem:[#allocation2 + $0x38]]  ;;  %v243_v10 = vstv %s676_s9  ;;  %v240_v32 = vmul.f32 %v239_v25, %v571_v23  ;;  %p478_p5 = scmp.ne.s32.totalorder %s357_s8, %s477_s27 }
  0x4d   :  { %v210_v29 = vadd.f32 %v209_v17, %v206_v22  ;;  %s702_s16 = sld [smem:[#allocation2 + $0x39]]  ;;  %v247_v34 = vstv %s681_s10  ;;  %v244_v38 = vmul.f32 %v243_v10, %v582_v33  ;;  %p482_p6 = scmp.lt.s32.totalorder %s357_s8, %s357_s8 }
  0x4e   :  { %v233_v31 = vadd.f32 %v232_v20, %v229_v5  ;;  %s707_s17 = sld [smem:[#allocation2 + $0x3a]]  ;;  %v248_v23 = vmul.f32 %v247_v34, %v592_v40  ;;  %v251_v41 = vstv %s685_s11  ;;  %p483_p7 = scmp.lt.s32.totalorder %s477_s27, %s477_s27 }
  0x4f   :  { %v214_v36 = vadd.f32 %v213_v24, %v210_v29  ;;  %s711_s18 = sld [smem:[#allocation2 + $0x3b]]  ;;  %v255_v44 = vstv %s690_s12  ;;  %v252_v49 = vmul.f32 %v251_v41, %v609_v54 }
  0x50   :  { %v237_v37 = vadd.f32 %v236_v27, %v233_v31  ;;  %s716_s0 = sld [smem:[#allocation2 + $0x46]]  ;;  %v256_v50 = vmul.f32 %v255_v44, %v622_v7  ;;  %v259_v59 = vstv %s694_s13  ;;  %p484_p8 = por %p483_p7, %p482_p6 }
  0x51   :  { %v217_v39 = vadd.f32 %v216_v30, %v214_v36  ;;  %v263_v42 = vstv %s420_s14  ;;  %s426_s19 = sld [smem:[#allocation2 + $0x3c]] }
  0x52   :  { %v241_v43 = vadd.f32 %v240_v32, %v237_v37  ;;  %v264_v45 = vmul.f32 %v263_v42, %v699_v28  ;;  %v266_v46 = vstv %s421_s15  ;;  %s427_s20 = sld [smem:[#allocation2 + $0x3d]]  ;;  %p485_p9 = pnand %p484_p8, %p478_p5 }
  0x53   :  { %v267_v47 = vmul.f32 %v266_v46, %v709_v35  ;;  %v270_v48 = vstv %s702_s16  ;;  %s428_s21 = sld [smem:[#allocation2 + $0x3e]]  ;;  %v218_v40 = vmax.f32 %v217_v39, 0.0 }
  0x54   :  { %v245_v33 = vadd.f32 %v244_v38, %v241_v43  ;;  %s429_s22 = sld [smem:[#allocation2 + $0x3f]]  ;;  %v271_v53 = vmul.f32 %v270_v48, %v713_v14  ;;  %v274_v55 = vstv %s707_s17 }
  0x55   :  { %s726_s23 = sld [smem:[#allocation2 + $0x40]]  ;;  %v268_v52 = vadd.f32 %v267_v47, %v264_v45  ;;  %v275_v60 = vmul.f32 %v274_v55, %v218_v40  ;;  %v278_v9 = vstv %s711_s18 }
  0x56   :  { %v249_v51 = vadd.f32 %v248_v23, %v245_v33  ;;  %s730_s24 = sld [smem:[#allocation2 + $0x47]]  ;;  %v282_v19 = vstv %s716_s0 }
  0x57   :  { %v286_v56 = vstv %s426_s19  ;;  %s432_s1 = sld [smem:[#allocation2 + $0x41]]  ;;  %v272_v63 = vadd.f32 %v271_v53, %v268_v52 }
  0x58   :  { %v253_v57 = vadd.f32 %v252_v49, %v249_v51  ;;  %v287_v58 = vmul.f32 %v286_v56, %v699_v28  ;;  %v289_v54 = vstv %s427_s20  ;;  %s433_s25 = sld [smem:[#allocation2 + $0x42]] }
  0x59   :  { %v290_v7 = vmul.f32 %v289_v54, %v709_v35  ;;  %v293_v61 = vstv %s428_s21  ;;  %s434_s26 = sld [smem:[#allocation2 + $0x43]]  ;;  %v276_v16 = vadd.f32 %v275_v60, %v272_v63 }
  0x5a   :  { %v257_v62 = vadd.f32 %v256_v50, %v253_v57  ;;  %v294_v2 = vmul.f32 %v293_v61, %v713_v14  ;;  %v297_v3 = vstv %s429_s22  ;;  %s435_s28 = sld [smem:[#allocation2 + $0x44]] }
  0x5b   :  { %v291_v4 = vadd.f32 %v290_v7, %v287_v58  ;;  %v298_v6 = vmul.f32 %v297_v3, %v218_v40  ;;  %s436_s29 = sld [smem:[#allocation2 + $0x45]]  ;;  %v301_v12 = vstv %s726_s23 }
  0x5c   :  { %v260_v8 = vadd.f32 %v259_v59, %v257_v62  ;;  %s736_s30 = sld [smem:[#allocation2 + $0x48]]  ;;  %v305_v26 = vstv %s730_s24 }
  0x5d   :  { %v295_v11 = vadd.f32 %v294_v2, %v291_v4  ;;  %v309_v13 = vstv %s432_s1  ;;  %s740_s3 = sld [smem:[#allocation2 + $0x49]] }
  0x5e   :  { %v261_v15 = vmax.f32 %v260_v8, 0.0  ;;  %v310_v17 = vmul.f32 %v309_v13, %v699_v28  ;;  %v312_v18 = vstv %s433_s25  ;;  %s439_s4 = sld [smem:[#allocation2 + $0x4a]] }
  0x5f   :  { %v299_v0 = vadd.f32 %v298_v6, %v295_v11  ;;  %v313_v20 = vmul.f32 %v312_v18, %v709_v35  ;;  %v316_v21 = vstv %s434_s26  ;;  %s440_s5 = sld [smem:[#allocation2 + $0x4b]] }
  0x60   :  { %v279_v1 = vmul.f32 %v278_v9, %v261_v15  ;;  %v302_v22 = vmul.f32 %v301_v12, %v261_v15  ;;  %v317_v24 = vmul.f32 %v316_v21, %v713_v14  ;;  %v320_v25 = vstv %s435_s28  ;;  %s441_s6 = sld [smem:[#allocation2 + $0x4c]] }
  0x61   :  { %v314_v5 = vadd.f32 %v313_v20, %v310_v17  ;;  %v321_v27 = vmul.f32 %v320_v25, %v218_v40  ;;  %v324_v29 = vstv %s436_s29 }
  0x62   :  { %v280_v10 = vadd.f32 %v279_v1, %v276_v16  ;;  %v303_v28 = vadd.f32 %v302_v22, %v299_v0  ;;  %v325_v31 = vmul.f32 %v324_v29, %v261_v15  ;;  %v328_v23 = vstv %s736_s30 }
  0x63   :  { %v318_v30 = vadd.f32 %v317_v24, %v314_v5  ;;  %v332_v36 = vstv %s740_s3 }
  0x64   :  { %v283_v32 = vadd.f32 %v282_v19, %v280_v10  ;;  %v306_v34 = vadd.f32 %v305_v26, %v303_v28  ;;  %v335_v37 = vstv %s439_s4 }
  0x65   :  { %v322_v35 = vadd.f32 %v321_v27, %v318_v30  ;;  %v339_v44 = vstv %s440_s5 }
  0x66   :  { %v284_v38 = vmax.f32 %v283_v32, 0.0  ;;  %v307_v39 = vmax.f32 %v306_v34, 0.0  ;;  %v343_v48 = vstv %s441_s6 }
  0x67   :  { %v326_v14 = vadd.f32 %v325_v31, %v322_v35 }
  0x68   :  { %v333_v41 = vmul.f32 %v332_v36, %v284_v38  ;;  %v336_v42 = vmul.f32 %v335_v37, %v307_v39 }
  0x69   :  { %v329_v43 = vadd.f32 %v328_v23, %v326_v14 }
  0x6a   :  { %v337_v46 = vadd.f32 %v336_v42, %v333_v41 }
  0x6b   :  { %v330_v45 = vmax.f32 %v329_v43, 0.0 }
  0x6d   :  { %v340_v47 = vmul.f32 %v339_v44, %v330_v45 }
  0x6f   :  { %v341_v33 = vadd.f32 %v340_v47, %v337_v46 }
  0x71   :  { %v344_v49 = vadd.f32 %v343_v48, %v341_v33 }
  0x73   :  { %v345_v40 = vmul.f32 0.5, %v344_v49 }
  0x75   :  { %447 = vtanh.f32 %v345_v40 }
  0x82   :  { %v448_v50 = vpop.eup %447 }
  0x83   :  { %v347_v51 = vmul.f32 0.5, %v448_v50 }
  0x85   :  { %v348_v52 = vadd.f32 0.5, %v347_v51 }
  0x87   :  { %349 = vst [vmem:[#allocation7] sm:$0xff] %v348_v52 }
  0x88   :  { %488 = shalt.err (!%p485_p9)
}
  0x89   :  { %359 = dma.vmem_to_hbm [thread:$0]  %s357_s8, 128, %s754_s2, [#allocation4]  }
  0x8a   :  { %501 = dma.done.wait [#allocation4], 128  }
  0x8b   :  { %502 = vsyncadd [#allocation4], 4294967168 }
  0x8c   :  { %363 = vsyncpa [#allocation3], 1 }
  0x8d   :  { %364 = vsyncpa [#allocation4], 1 }
  0x8e   :  { %365 = vsyncpa [#allocation5], 1 }

</bundles_post_ra>
